<compile_context>
chip_gen: v6e
topology: v6e:2x2x1
jax: 0.10.0
libtpu: 0.0.40
codegen_flags: <defaults>
</compile_context>

<pallas_src>
import numpy as np
import jax
import jax.numpy as jnp
from jax.experimental import pallas as pl
from jax.experimental.pallas import tpu as pltpu

BN_EPS = 1e-5


def _sppse_kernel(x_ref, p_ref, w1_ref, w2_ref, wc_ref, t_ref, o_ref):
    x = x_ref[0]                                    # (C, HW) bf16

    # ---- SPP adaptive average pooling as one matmul: (C, HW) @ (HW, R) -> (C, R)
    pooled = jnp.dot(x, p_ref[...], preferred_element_type=jnp.float32)

    # ---- FC1 (+ReLU) + FC2 -> gate column (channel, 1).  hidden is tiny
    # (in_channel // reduction), so keep this on the VPU; w1_ref[j] holds the
    # (C, R) weights of hidden unit j with the 1x1/2x2 pools already folded in.
    hidden = w1_ref.shape[0]
    channel = wc_ref.shape[0]
    w2 = w2_ref[...]                                # (channel, hidden)
    z = jnp.zeros((channel, 1), jnp.float32)
    for j in range(hidden):                         # static, unrolled
        hj = jnp.maximum(jnp.sum(pooled * w1_ref[j]), 0.0)
        z = z + hj * w2[:, j:j + 1]
    gate = jax.nn.sigmoid(z)                        # (channel, 1)

    # ---- 1x1 conv: bias+BN folded in glue, gate folded into the weights here
    # (sigmoid > 0, so ReLU commutes with the per-channel gating scale).
    wc_g = (wc_ref[...] * gate).astype(jnp.bfloat16)              # (channel, C)
    conv = jnp.dot(wc_g, x, preferred_element_type=jnp.float32)   # (channel, HW)
    o_ref[0] = jnp.maximum(conv + t_ref[...] * gate, 0.0)


def _pool_matrix(H, W, divisible):
    """Columns = averaging weights of the adaptive-pool regions, shape (HW, R).

    divisible (H%4==0 and W%4==0): R=16 (just the 4x4 regions, r = i4*4 + j4).
    otherwise: R=21, exact [1x1, 2x2 (i2*2+j2), 4x4 (i4*4+j4)] region weights.
    """
    def region_cols(k):
        cols = []
        for i in range(k):
            hs, he = (i * H) // k, -((-(i + 1) * H) // k)      # floor / ceil
            for j in range(k):
                ws, we = (j * W) // k, -((-(j + 1) * W) // k)
                m = np.zeros((H, W), np.float32)
                m[hs:he, ws:we] = 1.0 / ((he - hs) * (we - ws))
                cols.append(m.reshape(-1))
        return cols

    cols = region_cols(4) if divisible else (region_cols(1) + region_cols(2)
                                             + region_cols(4))
    return np.stack(cols, axis=1)                              # (HW, R)


def _fc1_eff(w1, C, divisible):
    """FC1 weights re-indexed as (hidden, C, R) acting on the pooled matrix.

    w1: (hidden, 21*C) acting on cat([pool1 (C), pool2 (4C), pool4 (16C)]) with
    PyTorch's channel-major flattening (index = c*k*k + region).
    In the divisible case the 1x1 / 2x2 pools are exact averages of the 16
    4x4 pools, so their weights are folded onto the 16 regions.
    """
    w1 = np.asarray(w1, np.float32)
    hidden = w1.shape[0]
    w_y1 = w1[:, :C]                                           # (hidden, C)
    w_y2 = w1[:, C:5 * C].reshape(hidden, C, 4)                # [:, c, i2*2+j2]
    w_y3 = w1[:, 5 * C:21 * C].reshape(hidden, C, 16)          # [:, c, i4*4+j4]
    if divisible:
        eff = np.zeros((hidden, C, 16), np.float32)
        for r in range(16):
            i4, j4 = r // 4, r % 4
            q2 = (i4 // 2) * 2 + (j4 // 2)
            eff[:, :, r] = w_y1 / 16.0 + w_y2[:, :, q2] / 4.0 + w_y3[:, :, r]
    else:
        eff = np.zeros((hidden, C, 21), np.float32)
        eff[:, :, 0] = w_y1
        eff[:, :, 1:5] = w_y2
        eff[:, :, 5:21] = w_y3
    return eff


def _vmem_limit_bytes(C, HW, channel, hidden, R):
    x_blk = C * HW * 2                       # bf16, double-buffered
    o_blk = channel * HW * 4                 # f32, double-buffered
    consts = (HW * R * 2 + hidden * C * R * 4 + channel * hidden * 4
              + channel * C * 4 + channel * 4)
    est = 2 * (x_blk + o_blk) + 2 * consts + (2 << 20)
    return int(min(max(est, 16 * 2**20), 64 * 2**20))   # stay within v7x VMEM


def sppse_forward(x_nchw, params):
    B, C, H, W = x_nchw.shape
    channel = params["conv_w"].shape[0]
    hidden = params["fc1_w"].shape[0]
    HW = H * W
    divisible = (H % 4 == 0) and (W % 4 == 0)

    # glue: NCHW -> (B, C, HW)  (free reshape, no transpose); bf16 halves x traffic
    x_flat = x_nchw.reshape(B, C, HW).astype(jnp.bfloat16)

    pmat = jnp.asarray(_pool_matrix(H, W, divisible), jnp.bfloat16)          # (HW, R)
    w1 = jnp.asarray(_fc1_eff(np.asarray(params["fc1_w"]), C, divisible))    # (hidden, C, R)
    R = pmat.shape[1]
    w2 = jnp.asarray(params["fc2_w"], jnp.float32)                           # (channel, hidden)

    # fold conv bias + BatchNorm (inference) into the 1x1 conv weights/bias
    scale = params["bn_gamma"] * jax.lax.rsqrt(params["bn_var"] + BN_EPS)    # (channel,)
    wc = params["conv_w"].reshape(channel, C) * scale[:, None]               # (channel, C)
    t = (params["bn_beta"] + (params["conv_b"] - params["bn_mean"]) * scale
         ).reshape(channel, 1)                                               # (channel, 1)

    def full(shape):
        nd = len(shape)
        return pl.BlockSpec(shape, lambda b, _n=nd: (0,) * _n)

    out = pl.pallas_call(
        _sppse_kernel,
        out_shape=jax.ShapeDtypeStruct((B, channel, HW), jnp.float32),
        grid_spec=pltpu.PrefetchScalarGridSpec(
            num_scalar_prefetch=0,
            grid=(B,),
            in_specs=[
                pl.BlockSpec((1, C, HW), lambda b: (b, 0, 0)),
                full((HW, R)),
                full((hidden, C, R)),
                full((channel, hidden)),
                full((channel, C)),
                full((channel, 1)),
            ],
            out_specs=pl.BlockSpec((1, channel, HW), lambda b: (b, 0, 0)),
        ),
        compiler_params=pltpu.CompilerParams(
            dimension_semantics=("parallel",),        # megacore sharding on v7x
            vmem_limit_bytes=_vmem_limit_bytes(C, HW, channel, hidden, R),
        ),
    )(x_flat, pmat, w1, w2, wc, t)

    # glue: (B, channel, HW) -> NCHW (free reshape)
    return out.reshape(B, channel, H, W)


def reference(x, params):
    """Pure-JAX f32 reference mirroring the PyTorch forward (inference-mode BN)."""
    B, C, H, W = x.shape
    channel = params["conv_w"].shape[0]

    def pool(k):
        return x.reshape(B, C, k, H // k, k, W // k).mean(axis=(3, 5))

    y1 = x.mean(axis=(2, 3)).reshape(B, C)
    y2 = pool(2).reshape(B, 4 * C)
    y3 = pool(4).reshape(B, 16 * C)
    y = jnp.concatenate([y1, y2, y3], axis=1)
    h = jnp.maximum(y @ params["fc1_w"].T, 0.0)
    gate = jax.nn.sigmoid(h @ params["fc2_w"].T)  # (B, channel)

    conv = jnp.einsum("bchw,oc->bohw", x, params["conv_w"].reshape(channel, C))
    conv = conv + params["conv_b"][None, :, None, None]
    scale = (params["bn_gamma"] * jax.lax.rsqrt(params["bn_var"] + BN_EPS))
    bn = (conv - params["bn_mean"][None, :, None, None]) * scale[None, :, None, None] \
         + params["bn_beta"][None, :, None, None]
    act = jnp.maximum(bn, 0.0)
    return gate[:, :, None, None] * act


if __name__ == "__main__":
    B, C_in, channel, reduction = 2, 32, 16, 16
    H = W = 16
    hidden = C_in // reduction  # 2

    key = jax.random.PRNGKey(0)
    kx, k1, k2, k3, k4, k5, k6, k7, k8 = jax.random.split(key, 9)

    x = jax.random.normal(kx, (B, C_in, H, W), jnp.float32)

    params = {
        "fc1_w": 0.05 * jax.random.normal(k1, (hidden, 21 * C_in), jnp.float32),
        "fc2_w": 0.05 * jax.random.normal(k2, (channel, hidden), jnp.float32),
        "conv_w": 0.1 * jax.random.normal(k3, (channel, C_in, 1, 1), jnp.float32),
        "conv_b": 0.1 * jax.random.normal(k4, (channel,), jnp.float32),
        "bn_gamma": 1.0 + 0.1 * jax.random.normal(k5, (channel,), jnp.float32),
        "bn_beta": 0.1 * jax.random.normal(k6, (channel,), jnp.float32),
        "bn_mean": 0.1 * jax.random.normal(k7, (channel,), jnp.float32),
        "bn_var": 0.8 + 0.2 * jnp.abs(jax.random.normal(k8, (channel,), jnp.float32)),
    }

    out = sppse_forward(x, params)
    out = jax.block_until_ready(out)

    ref = jax.block_until_ready(reference(x, params))
    # tolerances account for bf16 MXU inputs (f32 accumulation) vs the f32 reference
    np.testing.assert_allclose(np.asarray(out), np.asarray(ref), rtol=2e-2, atol=1e-2)

    print("KERNEL_OK")
</pallas_src>

<mosaic_0001>
module attributes {stable_mosaic.version = 11 : i64} {
  func.func @_sppse_kernel(%arg0: i32, %arg1: memref<1x32x256xbf16, #tpu.memory_space<vmem>>, %arg2: memref<256x16xbf16, #tpu.memory_space<vmem>>, %arg3: memref<2x32x16xf32, #tpu.memory_space<vmem>>, %arg4: memref<16x2xf32, #tpu.memory_space<vmem>>, %arg5: memref<16x32xf32, #tpu.memory_space<vmem>>, %arg6: memref<16x1xf32, #tpu.memory_space<vmem>>, %arg7: memref<1x16x256xf32, #tpu.memory_space<vmem>>) attributes {dimension_semantics = [#tpu.dimension_semantics<parallel>], iteration_bounds = array<i64: 2>, scalar_prefetch = 0 : i64, scratch_operands = 0 : i64, tpu.core_type = #tpu.core_type<tc>, window_params = [{transform_indices = @transform_0, window_bounds = array<i64: 1, 32, 256>}, {pipeline_mode = #tpu.pipeline_mode<synchronous>, transform_indices = @transform_1, window_bounds = array<i64: 256, 16>}, {pipeline_mode = #tpu.pipeline_mode<synchronous>, transform_indices = @transform_2, window_bounds = array<i64: 2, 32, 16>}, {pipeline_mode = #tpu.pipeline_mode<synchronous>, transform_indices = @transform_3, window_bounds = array<i64: 16, 2>}, {pipeline_mode = #tpu.pipeline_mode<synchronous>, transform_indices = @transform_4, window_bounds = array<i64: 16, 32>}, {pipeline_mode = #tpu.pipeline_mode<synchronous>, transform_indices = @transform_5, window_bounds = array<i64: 16, 1>}, {transform_indices = @transform_6, window_bounds = array<i64: 1, 16, 256>}]} {
    %c0 = arith.constant 0 : index
    %c0_0 = arith.constant 0 : index
    %c0_1 = arith.constant 0 : index
    %0 = vector.load %arg1[%c0, %c0_0, %c0_1] : memref<1x32x256xbf16, #tpu.memory_space<vmem>>, vector<1x32x256xbf16>
    %1 = vector.shape_cast %0 : vector<1x32x256xbf16> to vector<32x256xbf16>
    %c0_2 = arith.constant 0 : index
    %c0_3 = arith.constant 0 : index
    %2 = vector.load %arg2[%c0_2, %c0_3] : memref<256x16xbf16, #tpu.memory_space<vmem>>, vector<256x16xbf16>
    %cst = arith.constant dense<0.000000e+00> : vector<32x16xf32>
    %3 = tpu.matmul %1, %2, %cst {dimension_numbers = #tpu.dot_dimension_numbers<[1], [0], [0], [1], [0, 0, 1, 1], [], []>} : vector<32x256xbf16>, vector<256x16xbf16>, vector<32x16xf32> -> vector<32x16xf32>
    %c0_4 = arith.constant 0 : index
    %c0_5 = arith.constant 0 : index
    %4 = vector.load %arg4[%c0_4, %c0_5] : memref<16x2xf32, #tpu.memory_space<vmem>>, vector<16x2xf32>
    %cst_6 = arith.constant 0.000000e+00 : f32
    %5 = vector.broadcast %cst_6 : f32 to vector<16x1xf32>
    %c0_7 = arith.constant 0 : index
    %c0_8 = arith.constant 0 : index
    %c0_9 = arith.constant 0 : index
    %6 = vector.load %arg3[%c0_7, %c0_8, %c0_9] : memref<2x32x16xf32, #tpu.memory_space<vmem>>, vector<1x32x16xf32>
    %7 = vector.shape_cast %6 : vector<1x32x16xf32> to vector<32x16xf32>
    %8 = arith.mulf %3, %7 : vector<32x16xf32>
    %9 = vector.shape_cast %8 : vector<32x16xf32> to vector<1x32x16xf32>
    %cst_10 = arith.constant dense<0.000000e+00> : vector<1xf32>
    %10 = vector.multi_reduction <add>, %9, %cst_10 [1, 2] : vector<1x32x16xf32> to vector<1xf32>
    %11 = vector.shape_cast %10 : vector<1xf32> to vector<1x1x1xf32>
    %12 = vector.extract %11[0, 0, 0] : f32 from vector<1x1x1xf32>
    %cst_11 = arith.constant 0.000000e+00 : f32
    %13 = arith.maximumf %12, %cst_11 : f32
    %14 = vector.extract_strided_slice %4 {offsets = [0, 0], sizes = [16, 1], strides = [1, 1]} : vector<16x2xf32> to vector<16x1xf32>
    %15 = vector.broadcast %13 : f32 to vector<16x1xf32>
    %16 = arith.mulf %15, %14 : vector<16x1xf32>
    %17 = arith.addf %5, %16 : vector<16x1xf32>
    %c1 = arith.constant 1 : index
    %c0_12 = arith.constant 0 : index
    %c0_13 = arith.constant 0 : index
    %18 = vector.load %arg3[%c1, %c0_12, %c0_13] : memref<2x32x16xf32, #tpu.memory_space<vmem>>, vector<1x32x16xf32>
    %19 = vector.shape_cast %18 : vector<1x32x16xf32> to vector<32x16xf32>
    %20 = arith.mulf %3, %19 : vector<32x16xf32>
    %21 = vector.shape_cast %20 : vector<32x16xf32> to vector<1x32x16xf32>
    %cst_14 = arith.constant dense<0.000000e+00> : vector<1xf32>
    %22 = vector.multi_reduction <add>, %21, %cst_14 [1, 2] : vector<1x32x16xf32> to vector<1xf32>
    %23 = vector.shape_cast %22 : vector<1xf32> to vector<1x1x1xf32>
    %24 = vector.extract %23[0, 0, 0] : f32 from vector<1x1x1xf32>
    %cst_15 = arith.constant 0.000000e+00 : f32
    %25 = arith.maximumf %24, %cst_15 : f32
    %26 = vector.extract_strided_slice %4 {offsets = [0, 1], sizes = [16, 1], strides = [1, 1]} : vector<16x2xf32> to vector<16x1xf32>
    %27 = vector.broadcast %25 : f32 to vector<16x1xf32>
    %28 = arith.mulf %27, %26 : vector<16x1xf32>
    %29 = arith.addf %17, %28 : vector<16x1xf32>
    %30 = arith.negf %29 : vector<16x1xf32>
    %31 = math.exp %30 : vector<16x1xf32>
    %cst_16 = arith.constant 1.000000e+00 : f32
    %32 = vector.broadcast %cst_16 : f32 to vector<16x1xf32>
    %33 = arith.addf %32, %31 : vector<16x1xf32>
    %34 = arith.divf %32, %33 : vector<16x1xf32>
    %c0_17 = arith.constant 0 : index
    %c0_18 = arith.constant 0 : index
    %35 = vector.load %arg5[%c0_17, %c0_18] : memref<16x32xf32, #tpu.memory_space<vmem>>, vector<16x32xf32>
    %36 = vector.broadcast %34 : vector<16x1xf32> to vector<16x32xf32>
    %37 = arith.mulf %35, %36 : vector<16x32xf32>
    %38 = arith.truncf %37 : vector<16x32xf32> to vector<16x32xbf16>
    %cst_19 = arith.constant dense<0.000000e+00> : vector<16x256xf32>
    %39 = tpu.matmul %38, %1, %cst_19 {dimension_numbers = #tpu.dot_dimension_numbers<[1], [0], [0], [1], [0, 0, 1, 1], [], []>} : vector<16x32xbf16>, vector<32x256xbf16>, vector<16x256xf32> -> vector<16x256xf32>
    %c0_20 = arith.constant 0 : index
    %c0_21 = arith.constant 0 : index
    %40 = vector.load %arg6[%c0_20, %c0_21] : memref<16x1xf32, #tpu.memory_space<vmem>>, vector<16x1xf32>
    %41 = arith.mulf %40, %34 : vector<16x1xf32>
    %42 = vector.broadcast %41 : vector<16x1xf32> to vector<16x256xf32>
    %43 = arith.addf %39, %42 : vector<16x256xf32>
    %cst_22 = arith.constant 0.000000e+00 : f32
    %44 = vector.broadcast %cst_22 : f32 to vector<16x256xf32>
    %45 = arith.maximumf %43, %44 : vector<16x256xf32>
    %c0_23 = arith.constant 0 : index
    %c0_24 = arith.constant 0 : index
    %c0_25 = arith.constant 0 : index
    %46 = vector.load %arg7[%c0_23, %c0_24, %c0_25] : memref<1x16x256xf32, #tpu.memory_space<vmem>>, vector<1x16x256xf32>
    %47 = vector.shape_cast %46 : vector<1x16x256xf32> to vector<16x256xf32>
    %48 = vector.shape_cast %45 : vector<16x256xf32> to vector<1x16x256xf32>
    tpu.vector_store %arg7[%c0_23, %c0_24, %c0_25], %48 {strides = array<i32>} : memref<1x16x256xf32, #tpu.memory_space<vmem>>, vector<1x16x256xf32>,
    return
  }
  func.func @transform_0(%arg0: i32) -> (i32, i32, i32) {
    %c0_i32 = arith.constant 0 : i32
    %c0_i32_0 = arith.constant 0 : i32
    %c0_i32_1 = arith.constant 0 : i32
    return %arg0, %c0_i32, %c0_i32_0 : i32, i32, i32
  }
  func.func @transform_1(%arg0: i32) -> (i32, i32) {
    %c0_i32 = arith.constant 0 : i32
    %c0_i32_0 = arith.constant 0 : i32
    %c0_i32_1 = arith.constant 0 : i32
    return %c0_i32, %c0_i32_0 : i32, i32
  }
  func.func @transform_2(%arg0: i32) -> (i32, i32, i32) {
    %c0_i32 = arith.constant 0 : i32
    %c0_i32_0 = arith.constant 0 : i32
    %c0_i32_1 = arith.constant 0 : i32
    %c0_i32_2 = arith.constant 0 : i32
    return %c0_i32, %c0_i32_0, %c0_i32_1 : i32, i32, i32
  }
  func.func @transform_3(%arg0: i32) -> (i32, i32) {
    %c0_i32 = arith.constant 0 : i32
    %c0_i32_0 = arith.constant 0 : i32
    %c0_i32_1 = arith.constant 0 : i32
    return %c0_i32, %c0_i32_0 : i32, i32
  }
  func.func @transform_4(%arg0: i32) -> (i32, i32) {
    %c0_i32 = arith.constant 0 : i32
    %c0_i32_0 = arith.constant 0 : i32
    %c0_i32_1 = arith.constant 0 : i32
    return %c0_i32, %c0_i32_0 : i32, i32
  }
  func.func @transform_5(%arg0: i32) -> (i32, i32) {
    %c0_i32 = arith.constant 0 : i32
    %c0_i32_0 = arith.constant 0 : i32
    %c0_i32_1 = arith.constant 0 : i32
    return %c0_i32, %c0_i32_0 : i32, i32
  }
  func.func @transform_6(%arg0: i32) -> (i32, i32, i32) {
    %c0_i32 = arith.constant 0 : i32
    %c0_i32_0 = arith.constant 0 : i32
    %c0_i32_1 = arith.constant 0 : i32
    return %arg0, %c0_i32, %c0_i32_0 : i32, i32, i32
  }
}

</mosaic_0001>

<bundles_post_ra>
// kernel: tpu_custom_call.1
= control target key start
LH: loop header
LB: loop body
LE: loop exit
PB: predicated region body
PF: predicated region fallthrough
CT: control target
= control target key end

     0   :  { %11 = vsyncpa [#allocation3], 0  ;;  %s1148_s0 = inlined_call_operand.vmem [shape: bf16[2,32,256], index: 0, kind: input, shape index: {}]   ;;  %s1149_s1 = inlined_call_operand.vmem [shape: bf16[256,16], index: 1, kind: input, shape index: {}]   ;;  %s1150_s2 = inlined_call_operand.vmem [shape: f32[2,32,16], index: 2, kind: input, shape index: {}]   ;;  %s1151_s3 = inlined_call_operand.vmem [shape: f32[16,2], index: 3, kind: input, shape index: {}]   ;;  %s1152_s4 = inlined_call_operand.vmem [shape: f32[16,32], index: 4, kind: input, shape index: {}]   ;;  %s1153_s5 = inlined_call_operand.vmem [shape: f32[16,1], index: 5, kind: input, shape index: {}]   ;;  %s1154_s6 = inlined_call_operand.hbm [shape: f32[2,16,256], index: 6, kind: output, shape index: {}]  }
   0x1   :  { %13 = vsyncpa [#allocation3 + $0x1], 0  ;;  %s948_s21 = smov 0   ;;  %s950_s22 = smov 0  }
   0x2   :  { %s952_s23 = smov 0   ;;  %s954_s24 = smov 0  }
   0x3 LB: > { %s969_s25 = sadd.s32 4294967295, %s905_s24   ;;  %s696_s26 = sadd.s32 4294967294, %s905_s24   ;;  %s905_s24 = sphi %s954_s24, %s1160_s24   ;;  %s901_s23 = sphi %s952_s23, %s1159_s23   ;;  %s897_s22 = sphi %s950_s22, %s1158_s22   ;;  %s893_s21 = sphi %s948_s21, %s1157_s21  }
   0x4   : > { %s973_s27 = sadd.s32 1, %s905_s24   ;;  %s157_s28 = sadd.s32 1, %s901_s23 }
   0x5   : > { %s154_s29 = ssub.s32 %s905_s24, %s973_s27  ;;  %p167_p0 = scmp.ne.s32.totalorder %s901_s23, %s897_s22 }
   0x6   : > { %p155_p1 = scmp.eq.s32.totalorder %s154_s29, 0  ;;  %p168_p2 = scmp.eq.s32.totalorder %s969_s25, 1 }
   0x7   : > { %p173_p3 = scmp.ne.s32.totalorder %s897_s22, %s893_s21  ;;  %p174_p4 = scmp.eq.s32.totalorder %s696_s26, 1 }
   0x8   : > { %s984_s30 = scalar_select %p155_p1, %s901_s23, %s157_s28  }
   0x9   : > { %p986_p5 = por %p168_p2, %p167_p0  ;;  %p990_p6 = por %p174_p4, %p173_p3 }
   0xa   : > { %p699_p7 = scmp.ge.s32.totalorder %s905_s24, 1  ;;  %p215_p8 = scmp.lt.s32.totalorder %s905_s24, 3 }
   0xc   : > { %p216_p9 = pnand %p699_p7, %p215_p8 }
   0xd   : > { %p245_p10 = scmp.lt.s32.totalorder (!%p216_p9), %s969_s25, 1  ;;  %s907_s28 = smov (!%p216_p9), 0.0  }
   0xe   : > { %219 = sbr.rel (%p216_p9) target bundleno = 972 (0x3cc), region = 44  ;;  %s242_s20 = sand.u32 (!%p216_p9), 1, %s897_s22  }
   0xf   : > { %s1108_s13 = scalar_lea.sflag (!%p216_p9), [#allocation3], %s242_s20  ;;  %s910_s14 = smov (!%p216_p9), [#allocation2]  }
  0x10   : > { %s849_s15 = sshll.u32 (!%p216_p9), %s910_s14, 4  ;;  %s850_s15 = int_to_ptr.vmem [resolvable:$false] %s849_s15 }
  0x13   : > { %v815_v0 = vld [vmem:[%s1149_s1 + $0x78] sm:$0xff]   ;;  %v817_v2 = vld [vmem:[%s1149_s1 + $0x70] sm:$0xff]   ;;  %v819_v4 = vld [vmem:[%s1149_s1 + $0x68] sm:$0xff]   ;;  %s246_s26 = scalar_select %p245_p10, %s969_s25, 1  ;;  %vm462_vm0 = vcmask 130048   ;;  %vm565_vm1 = vcmask 261120  }
  0x14   : > { %v816_v1 = vld [vmem:[%s1149_s1 + $0x38] sm:$0xff]   ;;  %737 = vmatprep.subr.bf16.mxu0 %v815_v0  ;;  %v818_v3 = vld [vmem:[%s1149_s1 + $0x30] sm:$0xff]   ;;  %v820_v5 = vld [vmem:[%s1149_s1 + $0x28] sm:$0xff]  }
  0x15   : > { %738 = vmatpush3.bf16.msra.mxu0 %v816_v1  ;;  %v821_v6 = vld [vmem:[%s1149_s1 + $0x60] sm:$0xff]   ;;  %s735_s11 = sshll.u32 %s246_s26, 5  ;;  %v823_v8 = vld [vmem:[%s1149_s1 + $0x58] sm:$0xff]   ;;  %v825_v10 = vld [vmem:[%s1149_s1 + $0x50] sm:$0xff]  }
  0x16   : > { %739 = vmatprep.subr.bf16.mxu0 %v817_v2  ;;  %v822_v7 = vld [vmem:[%s1149_s1 + $0x20] sm:$0xff]   ;;  %s249_s16 = scalar_lea.vmem %s1148_s0, %s735_s11  ;;  %v824_v9 = vld [vmem:[%s1149_s1 + $0x18] sm:$0xff]   ;;  %v826_v13 = vld [vmem:[%s1149_s1 + $0x10] sm:$0xff]   ;;  %s908_s11 = smov 127  }
  0x17   : > { %v833_v11 = vld [vmem:[%s249_s16 + $0x4] ss:$8 sps:$4 sm:$0xff]   ;;  %v834_v12 = vld [vmem:[%s249_s16 + $0x14] ss:$8 sps:$4 sm:$0xff]   ;;  %v836_v14 = vld [vmem:[%s249_s16 + $0x10] ss:$8 sps:$4 sm:$0xff]  }
  0x18   : > { %435 = vmatprep.mubr.bf16.mxu0 %v833_v11  ;;  %v827_v15 = vld [vmem:[%s1149_s1 + $0x48] sm:$0xff]   ;;  %581 = vmatprep.subr.bf16.mxu1 %v834_v12  ;;  %v829_v18 = vld [vmem:[%s1149_s1 + $0x40] sm:$0xff]   ;;  %v456_v32 = vld [vmem:[%s1150_s2 + $0x10] sm:$0xff] }
  0x19   : > { %740 = vmatpush3.bf16.msra.mxu0 %v818_v3  ;;  %582 = vmatpush1.bf16.msra.mxu1 %v836_v14  ;;  %v828_v16 = vld [vmem:[%s1149_s1 + $0x8] sm:$0xff]   ;;  %v830_v19 = vld [vmem:[%s1149_s1] sm:$0xff]   ;;  %v725_v36 = vld [vmem:[%s1150_s2 + $0x30] sm:$0xff] }
  0x1a   : > { %741 = vmatprep.subr.bf16.mxu0 %v819_v4  ;;  %583 = vmatprep.subr.bf16.mxu1 %v833_v11  ;;  %v831_v17 = vld [vmem:[%s249_s16] ss:$8 sps:$4 sm:$0xff]   ;;  %v457_v43 = vld [vmem:[%s1150_s2 + $0x18] sm:$0xff]  ;;  %s851_s16 = scalar_lea.vmem %s850_s15, 1024 }
  0x1b   : > { %v455_v24 = vld [vmem:[%s1150_s2 + $0x8] sm:$0xff]  ;;  %v454_v27 = vld [vmem:[%s1150_s2] sm:$0xff]  ;;  %v726_v44 = vld [vmem:[%s1150_s2 + $0x38] sm:$0xff] }
  0x1c   : > { %v724_v30 = vld [vmem:[%s1150_s2 + $0x28] sm:$0xff]  ;;  %v723_v34 = vld [vmem:[%s1150_s2 + $0x20] sm:$0xff] }
  0x1d   : > { %742 = vmatpush3.bf16.msra.mxu0 %v820_v5  ;;  %584 = vmatpush1.bf16.msra.mxu1 %v831_v17 }
  0x1e   : > { %743 = vmatprep.subr.bf16.mxu0 %v821_v6 }
  0x21   : > { %744 = vmatpush3.bf16.msra.mxu0 %v822_v7 }
  0x22   : > { %745 = vmatprep.subr.bf16.mxu0 %v823_v8 }
  0x25   : > { %746 = vmatpush3.bf16.msra.mxu0 %v824_v9 }
  0x26   : > { %747 = vmatprep.subr.bf16.mxu0 %v825_v10 }
  0x29   : > { %748 = vmatpush3.bf16.msra.mxu0 %v826_v13  ;;  %v453_v13 = vld [vmem:[%s1151_s3 + $0x8] sm:$0xff] }
  0x2a   : > { %749 = vmatprep.subr.bf16.mxu0 %v827_v15 }
  0x2d   : > { %750 = vmatpush3.bf16.msra.mxu0 %v828_v16 }
  0x2e   : > { %751 = vmatprep.subr.bf16.mxu0 %v829_v18 }
  0x31   : > { %752 = vmatpush3.bf16.msra.mxu0 %v830_v19 }
  0x34   : > { %436 = vmatmul.mubr.bf16.vlgmr.msra.gmra.mxu0 %v831_v17 }
  0x35   : > { %443 = vmatprep.mubr.bf16.mxu0 %v834_v12  ;;  %v452_v12 = vld [vmem:[%s1151_s3] sm:$0xff] }
  0x3c   : > { %444 = vmatmul.mubr.bf16.gmra.mxu0 %v836_v14 }
  0xf4   : > { %v753_v20 = vpop.f32.mrf.mxu0 }
  0xf6   : > { %v754_v21 = vpop.f32.mrf.mxu0 }
  0xf7   : > { %v755_v25 = vadd.f32 %v754_v21, %v753_v20  ;;  %v909_v20 = vmov 0  }
  0xf8   : > { %v756_v22 = vpop.f32.mrf.mxu0  ;;  %813 = vset.pattern.permute.xlu0 %v909_v20  ;;  %814 = vset.pattern.permute.xlu1 %v909_v20 }
  0xf9   : > { %v458_v33 = vmul.f32 %v755_v25, %v454_v27  ;;  %v490_v41 = vmul.f32 %v755_v25, %v723_v34  ;;  %601 = vmatprep.mubr.bf16.mxu1 %v909_v20 }
  0xfa   : > { %v757_v23 = vpop.f32.mrf.mxu0 }
  0xfb   : > { %v758_v26 = vadd.f32 %v757_v23, %v756_v22  ;;  %v463_v45 = vsel %vm462_vm0, %v458_v33, 0.0  ;;  %v494_v54 = vsel %vm462_vm0, %v490_v41, 0.0  ;;  %v551_v33 = vld [vmem:[%s1153_s5] sm:$0xff] }
  0xfc   : > { %v759_v28 = vpop.f32.mrf.mxu0 }
  0xfd   : > { %v459_v29 = vmul.f32 %v758_v26, %v455_v24  ;;  %v491_v39 = vmul.f32 %v758_v26, %v724_v30 }
  0xfe   : > { %v760_v31 = vpop.f32.mrf.mxu0 }
  0xff   : > { %v761_v35 = vadd.f32 %v760_v31, %v759_v28  ;;  %v464_v38 = vsel %vm462_vm0, %v459_v29, 0.0  ;;  %v495_v50 = vsel %vm462_vm0, %v491_v39, 0.0  ;;  %v537_v39 = vld [vmem:[%s1152_s4 + $0x8] sm:$0xff] }
 0x100   : > { %v762_v37 = vpop.f32.mrf.mxu0  ;;  %v465_v49 = vadd.f32 %v464_v38, %v463_v45  ;;  %v496_v58 = vadd.f32 %v495_v50, %v494_v54 }
 0x101   : > { %v460_v40 = vmul.f32 %v761_v35, %v456_v32  ;;  %v492_v46 = vmul.f32 %v761_v35, %v725_v36  ;;  %v552_v35 = vld [vmem:[%s1153_s5 + $0x8] sm:$0xff] }
 0x102   : > { %v763_v42 = vpop.f32.mrf.mxu0 }
 0x103   : > { %v764_v47 = vadd.f32 %v763_v42, %v762_v37  ;;  %v466_v48 = vsel %vm462_vm0, %v460_v40, 0.0  ;;  %v497_v56 = vsel %vm462_vm0, %v492_v46, 0.0  ;;  %v536_v37 = vld [vmem:[%s1152_s4] sm:$0xff] }
 0x104   : > { %v467_v53 = vadd.f32 %v466_v48, %v465_v49  ;;  %v498_v60 = vadd.f32 %v497_v56, %v496_v58 }
 0x105   : > { %v461_v51 = vmul.f32 %v764_v47, %v457_v43  ;;  %v493_v52 = vmul.f32 %v764_v47, %v726_v44 }
 0x107   : > { %v468_v55 = vsel %vm462_vm0, %v461_v51, 0.0  ;;  %v499_v59 = vsel %vm462_vm0, %v493_v52, 0.0 }
 0x108   : > { %v469_v57 = vadd.f32 %v468_v55, %v467_v53  ;;  %v500_v61 = vadd.f32 %v499_v59, %v498_v60 }
 0x10a   : > { %470 = vadd.xlane.f32.xlu0 %v469_v57 }
 0x10e   : > { %501 = vadd.xlane.f32.xlu0 %v500_v61 }
 0x193   : > { %v471_v62 = vpop.xlane.xlu0 %470 }
 0x194   : > { %v472_v63 = vrot.slane %v471_v62, 4 }
 0x196   : > { %v473_v0 = vadd.f32 %v472_v63, %v471_v62 }
 0x197   : > { %v502_v1 = vpop.xlane.xlu0 %501 }
 0x198   : > { %v474_v2 = vrot.slane %v473_v0, 2  ;;  %v503_v3 = vrot.slane %v502_v1, 4 }
 0x19a   : > { %v504_v4 = vadd.f32 %v503_v3, %v502_v1  ;;  %v475_v5 = vadd.f32 %v474_v2, %v473_v0 }
 0x19c   : > { %v505_v6 = vrot.slane %v504_v4, 2  ;;  %v476_v7 = vrot.slane %v475_v5, 1 }
 0x19e   : > { %v477_v8 = vadd.f32 %v476_v7, %v475_v5  ;;  %v506_v9 = vadd.f32 %v505_v6, %v504_v4 }
 0x1a0   : > { %765 = vpush %v477_v8  ;;  %v507_v10 = vrot.slane %v506_v9, 1 }
 0x1a2   : > { %v508_v11 = vadd.f32 %v507_v10, %v506_v9 }
 0x1a4   : > { %767 = vpush %v508_v11 }
 0x1d1   : > { %s766_s26 = spop %765 }
 0x1d2   : > { %s479_s29 = smax.f32 %s907_s28, %s766_s26  ;;  %s700_s26 = sshll.u32 %s242_s20, 5 }
 0x1d3   : > { %v480_v14 = vstv %s479_s29 }
 0x1d4   : > { %v481_v15 = vmul.f32 %v480_v14, %v452_v12  ;;  %v482_v16 = vmul.f32 %v480_v14, %v453_v13 }
 0x1d5   : > { %s768_s9 = spop %767 }
 0x1d6   : > { %s510_s10 = smax.f32 %s907_s28, %s768_s9  ;;  %s244_s28 = scalar_lea.vmem [#allocation2], %s700_s26 }
 0x1d7   : > { %v511_v17 = vstv %s510_s10  ;;  %s634_s29 = sshll.u32 %s244_s28, 4  ;;  %s736_s9 = sshll.u32 %s969_s25, 9  ;;  %s1101_s29 = int_to_ptr.vmem [resolvable:$true] %s634_s29 }
 0x1d8   : > { %v512_v18 = vmul.f32 %v511_v17, %v452_v12  ;;  %v513_v19 = vmul.f32 %v511_v17, %v453_v13  ;;  %s1106_s12 = scalar_lea.hbm %s1154_s6, %s736_s9  ;;  %s845_s25 = scalar_lea.vmem %s1101_s29, 512 }
 0x1d9   : > { %p846_p11 = scmp.ne.s32.totalorder %s1101_s29, %s845_s25  ;;  %p852_p0 = scmp.lt.s32.totalorder %s1101_s29, %s850_s15 }
 0x1da   : > { %516 = vrot.lane.b32.xlu1 %v512_v18, %s908_s11  ;;  %p853_p1 = scmp.lt.s32.totalorder %s851_s16, %s845_s25 }
 0x1db   : > { %p847_p12 = pnand %p846_p11, %p986_p5 }
 0x1dc   : > { %p854_p2 = por %p853_p1, %p852_p0 }
 0x1dd   : > { %p848_p13 = pneg %p847_p12 }
 0x1de   : > { %518 = vrot.lane.b32.xlu1 %v513_v19, %s908_s11 }
 0x1df   : > { %p855_p3 = pnand %p854_p2, %p848_p13 }
 0x24c   : > { %v517_v21 = vpop.permute.xlu1 %516 }
 0x24d   : > { %v522_v22 = vadd.f32 %v517_v21, %v481_v15 }
 0x24f   : > { %v727_v23 = vmul.f32 -1.442695, %v522_v22 }
 0x250   : > { %v519_v24 = vpop.permute.xlu1 %518 }
 0x251   : > { %837 = vpow2.f32 %v727_v23  ;;  %v523_v25 = vadd.f32 %v519_v24, %v482_v16 }
 0x253   : > { %v728_v26 = vmul.f32 -1.442695, %v523_v25 }
 0x255   : > { %839 = vpow2.f32 %v728_v26 }
 0x25e   : > { %v838_v27 = vpop.eup %837 }
 0x25f   : > { %v530_v28 = vadd.f32 1.0, %v838_v27 }
 0x261   : > { %841 = vrcp.f32 %v530_v28 }
 0x262   : > { %v840_v29 = vpop.eup %839 }
 0x263   : > { %v531_v30 = vadd.f32 1.0, %v840_v29 }
 0x265   : > { %843 = vrcp.f32 %v531_v30 }
 0x26e   : > { %v842_v31 = vpop.eup %841 }
 0x26f   : > { %540 = vperm.xlu0 %813, %v842_v31   ;;  %v553_v34 = vmul.f32 %v842_v31, %v551_v33 }
 0x272   : > { %v844_v32 = vpop.eup %843 }
 0x273   : > { %545 = vperm.xlu1 %814, %v844_v32   ;;  %v554_v36 = vmul.f32 %v844_v32, %v552_v35 }
 0x277   : > { %557 = vperm.xlu1 %814, %v553_v34  }
 0x27b   : > { %562 = vperm.xlu1 %814, %v554_v36  }
 0x2ea   : > { %v541_v38 = vpop.permute.xlu0 %540 }
 0x2eb   : > { %v548_v41 = vmul.f32 %v541_v38, %v536_v37 }
 0x2ee   : > { %v546_v40 = vpop.permute.xlu1 %545 }
 0x2ef   : > { %v549_v42 = vmul.f32 %v546_v40, %v537_v39 }
 0x2f1   : > { %v550_v43 = vpack.c.bf16 %v549_v42, %v548_v41 }
 0x2f2   : > { %v558_v44 = vpop.permute.xlu1 %557 }
 0x2f3   : > { %729 = vmatmul.mubr.msk.bf16.vlgmr.msra.gmra.mxu1 %vm565_vm1, %v550_v43 }
 0x2f6   : > { %v563_v50 = vpop.permute.xlu1 %562 }
 0x3b3   : > { %v603_v45 = vpop.f32.mrf.mxu1 }
 0x3b4   : > { %v604_v46 = vadd.f32 %v603_v45, %v558_v44 }
 0x3b5   : > { %v605_v47 = vpop.f32.mrf.mxu1 }
 0x3b6   : > { %v612_v48 = vmax.f32 %v604_v46, 0.0  ;;  %v606_v49 = vadd.f32 %v605_v47, %v558_v44 }
 0x3b7   : > { %v607_v51 = vpop.f32.mrf.mxu1 }
 0x3b8   : > { %616 = vst [vmem:[%s244_s28] sm:$0xff] %v612_v48  ;;  %v613_v52 = vmax.f32 %v606_v49, 0.0  ;;  %v608_v53 = vadd.f32 %v607_v51, %v563_v50 }
 0x3b9   : > { %v609_v54 = vpop.f32.mrf.mxu1 }
 0x3ba   : > { %617 = vst [vmem:[%s244_s28 + $0x8] sm:$0xff] %v613_v52  ;;  %v614_v55 = vmax.f32 %v608_v53, 0.0  ;;  %v610_v56 = vadd.f32 %v609_v54, %v563_v50 }
 0x3bc   : > { %618 = vst [vmem:[%s244_s28 + $0x10] sm:$0xff] %v614_v55  ;;  %v615_v57 = vmax.f32 %v610_v56, 0.0 }
 0x3be   : > { %619 = vst [vmem:[%s244_s28 + $0x18] sm:$0xff] %v615_v57 }
 0x3bf   : > { %858 = shalt.err (!%p855_p3)
}
 0x3c0   : > { %s859_s17 = scalar_lea.hbm %s1106_s12, 512  ;;  %s863_s20 = scalar_lea.hbm %s1154_s6, 1024 }
 0x3c1   : > { %p860_p4 = scmp.ne.s32.totalorder %s1106_s12, %s859_s17  ;;  %p864_p9 = scmp.lt.s32.totalorder %s1106_s12, %s1154_s6 }
 0x3c2   : > { %p865_p10 = scmp.lt.s32.totalorder %s863_s20, %s859_s17 }
 0x3c3   : > { %p861_p7 = pnand %p860_p4, %p986_p5 }
 0x3c4   : > { %p866_p11 = por %p865_p10, %p864_p9 }
 0x3c5   : > { %p862_p8 = pneg %p861_p7 }
 0x3c7   : > { %p867_p12 = pnand %p866_p11, %p862_p8 }
 0x3c9   : > { %870 = shalt.err (!%p867_p12)
}
 0x3ca   : > { %s911_s9 = smov 256   ;;  %s912_s10 = smov 16  }
 0x3cb   : > { %769 = dma.vmem_to_hbm [thread:$0]  (%p986_p5), %s1101_s29, 512, %s1106_s12, %s1108_s13, %s911_s9, %s911_s9, %s912_s10  }
 0x3cc PF: > { %p775_p13 = scmp.ge.s32.totalorder %s905_s24, 2  ;;  %s649_s11 = sand.u32 1, %s893_s21  }
 0x3cd   : > { %s650_s25 = scalar_lea.sflag [#allocation3], %s649_s11 }
 0x3ce   : > { %p772_p0 = pnand %p775_p13, %p990_p6 }
 0x3d0   : > { %p773_p1 = pneg %p772_p0 }
 0x3d2   : > { %888 = dma.done.wait (%p773_p1), %s650_s25, 512  }
 0x3d3   : > { %890 = vsyncadd (%p773_p1), %s650_s25, 4294966784  ;;  %p16_p2 = scmp.ge.s32.totalorder %s973_s27, 4   ;;  %s1157_s21 = smov %s897_s22 }
 0x3d4   : > { %s1158_s22 = smov %s901_s23  ;;  %s1159_s23 = smov %s984_s30 }
 0x3d5   : > { %s1160_s24 = smov %s973_s27  ;;  %18 = sbr.rel (!%p16_p2) target bundleno = 3 (0x3), region = 80 }
 0x3da   :  { %655 = vsyncpa [#allocation3], 1 }
 0x3db   :  { %657 = vsyncpa [#allocation3 + $0x1], 1 }

</bundles_post_ra>
